<compile_context>
chip_gen: v7x
topology: tpu7x:2x2x1
jax: 0.10.0
libtpu: 0.0.40
codegen_flags: <defaults>
</compile_context>

<pallas_src>
import math

import jax
import jax.numpy as jnp
from jax.experimental import pallas as pl
from jax.experimental.pallas import tpu as pltpu


def make_pe(d_model: int, max_len: int = 24) -> jnp.ndarray:
    """Deterministic sinusoidal PE buffer, identical to the PyTorch __init__."""
    position = jnp.arange(max_len, dtype=jnp.float32)[:, None]              # (L, 1)
    div_term = jnp.exp(
        jnp.arange(0, d_model, 2, dtype=jnp.float32) * (-math.log(10000.0) / d_model)
    )                                                                        # (d/2,)
    pe = jnp.zeros((max_len, d_model), dtype=jnp.float32)
    pe = pe.at[:, 0::2].set(jnp.sin(position * div_term))
    pe = pe.at[:, 1::2].set(jnp.cos(position * div_term))
    return pe                                                                # (L, d)


def _add_pe_kernel(x_ref, pe_ref, o_ref):
    # x_ref: (tile_r, tile_c) tile; pe_ref: (tile_r, 1) broadcast over the lane axis.
    o_ref[...] = x_ref[...] + pe_ref[...]


def _round_down(a: int, m: int) -> int:
    return (a // m) * m


_TARGET_VMEM_BYTES = 10 * 1024 * 1024  # total double-buffered VMEM budget (all gens)
_LANE = 128


def _pick_tiles(rows: int, cols: int, itemsize: int):
    """Pick (tile_r, tile_c) so 2x(x)+2x(out)+2x(pe) tiles fit ~10 MiB of VMEM."""
    sub = max(8, 32 // itemsize)            # sublane multiple: 8 f32 / 16 bf16 / 32 i8
    budget_elems = _TARGET_VMEM_BYTES // itemsize

    cols_pad = -(-cols // _LANE) * _LANE    # lane padding as seen in VMEM
    # Prefer the full row width (fully contiguous DMA per tile) if it fits.
    if (4 * cols_pad + 2 * _LANE) * sub <= budget_elems:
        tile_c = cols                       # full dim: always layout-legal
    else:
        tile_c = max(_LANE, _round_down((budget_elems // sub - 2 * _LANE) // 4, _LANE))

    tile_c_pad = -(-tile_c // _LANE) * _LANE
    per_row_elems = 4 * tile_c_pad + 2 * _LANE   # 2x x + 2x out + 2x pe (lane-padded)
    budget_r = max(sub, budget_elems // per_row_elems)
    if rows <= budget_r:
        tile_r = rows                       # full dim: always layout-legal
    else:
        tile_r = max(sub, _round_down(budget_r, sub))
    return tile_r, tile_c


def time_positional_encoding(x: jnp.ndarray, pe: jnp.ndarray) -> jnp.ndarray:
    """x: (b, c, f, h, w); pe: (max_len, d_model=c) float32."""
    b, c, f, h, w = x.shape
    if f > pe.shape[0] or c != pe.shape[1]:
        raise ValueError("f must be <= max_len and c must equal d_model")

    rows, cols = b * c * f, h * w
    itemsize = jnp.dtype(x.dtype).itemsize

    # Per-row PE scalar: row = (b_i*c + c_i)*f + f_i  ->  pe[f_i, c_i], replicated
    # over b (b*c*f elements total: negligible HBM traffic).
    pe_rows = (
        jnp.broadcast_to(pe[:f, :].T[None, :, :], (b, c, f))
        .reshape(rows, 1)
        .astype(x.dtype)
    )
    x2 = x.reshape(rows, cols)              # contiguous view, no data movement

    tile_r, tile_c = _pick_tiles(rows, cols, itemsize)
    grid = (pl.cdiv(rows, tile_r), pl.cdiv(cols, tile_c))

    out2 = pl.pallas_call(
        _add_pe_kernel,
        out_shape=jax.ShapeDtypeStruct((rows, cols), x.dtype),
        grid_spec=pltpu.PrefetchScalarGridSpec(
            num_scalar_prefetch=0,
            grid=grid,
            in_specs=[
                pl.BlockSpec((tile_r, tile_c), lambda i, j: (i, j)),
                pl.BlockSpec((tile_r, 1), lambda i, j: (i, 0)),
            ],
            out_specs=pl.BlockSpec((tile_r, tile_c), lambda i, j: (i, j)),
        ),
        # Elementwise add: write back into x2's HBM buffer (true in-place when the
        # caller donates x, e.g. via jax.jit(..., donate_argnums=(0,))).
        input_output_aliases={0: 0},
        compiler_params=pltpu.CompilerParams(
            dimension_semantics=("parallel", "parallel"),
            vmem_limit_bytes=32 * 1024 * 1024,
        ),
    )(x2, pe_rows)

    # Dropout(p=0.0) is the identity; nothing to do.
    return out2.reshape(b, c, f, h, w)


if __name__ == "__main__":
    key = jax.random.PRNGKey(0)
    b, c, f, h, w = 2, 8, 6, 8, 8          # d_model = c = 8, f <= max_len = 24
    x = jax.random.normal(key, (b, c, f, h, w), dtype=jnp.float32)

    pe = make_pe(d_model=c, max_len=24)

    # Reference in plain JAX (mirrors the PyTorch rearrange + add).
    # Computed BEFORE the kernel call because x is donated to the kernel.
    ref = jax.block_until_ready(x + pe[:f, :].T[None, :, :, None, None])

    tpe = jax.jit(time_positional_encoding, donate_argnums=(0,))
    out = jax.block_until_ready(tpe(x, pe))

    assert out.shape == (b, c, f, h, w) and out.dtype == jnp.float32
    assert jnp.allclose(out, ref, atol=1e-6), "mismatch vs reference"

    print("KERNEL_OK")
</pallas_src>

<mosaic_0001>
module attributes {stable_mosaic.version = 11 : i64} {
  func.func @_add_pe_kernel(%arg0: i32, %arg1: i32, %arg2: memref<96x64xf32, #tpu.memory_space<vmem>>, %arg3: memref<96x1xf32, #tpu.memory_space<vmem>>, %arg4: memref<96x64xf32, #tpu.memory_space<vmem>>) attributes {dimension_semantics = [#tpu.dimension_semantics<parallel>, #tpu.dimension_semantics<parallel>], iteration_bounds = array<i64: 1, 1>, scalar_prefetch = 0 : i64, scratch_operands = 0 : i64, tpu.core_type = #tpu.core_type<tc>, window_params = [{transform_indices = @transform_0, window_bounds = array<i64: 96, 64>}, {transform_indices = @transform_1, window_bounds = array<i64: 96, 1>}, {transform_indices = @transform_2, window_bounds = array<i64: 96, 64>}]} {
    %c0 = arith.constant 0 : index
    %c0_0 = arith.constant 0 : index
    %0 = vector.load %arg2[%c0, %c0_0] : memref<96x64xf32, #tpu.memory_space<vmem>>, vector<96x64xf32>
    %c0_1 = arith.constant 0 : index
    %c0_2 = arith.constant 0 : index
    %1 = vector.load %arg3[%c0_1, %c0_2] : memref<96x1xf32, #tpu.memory_space<vmem>>, vector<96x1xf32>
    %2 = vector.broadcast %1 : vector<96x1xf32> to vector<96x64xf32>
    %3 = arith.addf %0, %2 : vector<96x64xf32>
    %c0_3 = arith.constant 0 : index
    %c0_4 = arith.constant 0 : index
    %4 = vector.load %arg4[%c0_3, %c0_4] : memref<96x64xf32, #tpu.memory_space<vmem>>, vector<96x64xf32>
    tpu.vector_store %arg4[%c0_3, %c0_4], %3 {strides = array<i32>} : memref<96x64xf32, #tpu.memory_space<vmem>>, vector<96x64xf32>,
    return
  }
  func.func @transform_0(%arg0: i32, %arg1: i32) -> (i32, i32) {
    %c0_i32 = arith.constant 0 : i32
    return %arg0, %arg1 : i32, i32
  }
  func.func @transform_1(%arg0: i32, %arg1: i32) -> (i32, i32) {
    %c0_i32 = arith.constant 0 : i32
    %c0_i32_0 = arith.constant 0 : i32
    return %arg0, %c0_i32 : i32, i32
  }
  func.func @transform_2(%arg0: i32, %arg1: i32) -> (i32, i32) {
    %c0_i32 = arith.constant 0 : i32
    return %arg0, %arg1 : i32, i32
  }
}

</mosaic_0001>

<bundles_post_ra>
// kernel: time_positional_encoding.1
= control target key start
LH: loop header
LB: loop body
LE: loop exit
PB: predicated region body
PF: predicated region fallthrough
CT: control target
= control target key end

     0   :  { %v127_v0 = vmov 0   ;;  %vm107_vm0 = vcmask 523264   ;;  %s263_s1 = inlined_call_operand.vmem [shape: f32[96,1], index: 1, kind: input, shape index: {}]   ;;  %s264_s0 = inlined_call_operand.vmem [shape: f32[96,64], index: 0, kind: input, shape index: {}, may-alias: {0,2}]   ;;  %s265_s2 = inlined_call_operand.vmem [shape: f32[96,64], index: 2, kind: output, shape index: {}, may-alias: {0,2}]  }
   0x1   :  { %126 = vset.pattern.permute.xlu1 %v127_v0  ;;  %125 = vset.pattern.permute.xlu0 %v127_v0  ;;  %v25_v1 = vld [vmem:[%s263_s1 + $0x10] sm:$0xff]  ;;  %v23_v2 = vld [vmem:[%s263_s1] sm:$0xff]  ;;  %v26_v3 = vld [vmem:[%s263_s1 + $0x18] sm:$0xff] }
   0x2   :  { %47 = vperm.xlu1 %126, %v25_v1   ;;  %37 = vperm.xlu0 %125, %v23_v2   ;;  %v24_v4 = vld [vmem:[%s263_s1 + $0x8] sm:$0xff]  ;;  %v27_v6 = vld [vmem:[%s263_s1 + $0x20] sm:$0xff]  ;;  %v30_v7 = vld [vmem:[%s263_s1 + $0x38] sm:$0xff] }
   0x3   :  { %v28_v5 = vld [vmem:[%s263_s1 + $0x28] sm:$0xff]  ;;  %v29_v8 = vld [vmem:[%s263_s1 + $0x30] sm:$0xff]  ;;  %v31_v10 = vld [vmem:[%s263_s1 + $0x40] sm:$0xff] }
   0x4   :  { %v32_v9 = vld [vmem:[%s263_s1 + $0x48] sm:$0xff]  ;;  %v34_v11 = vld [vmem:[%s263_s1 + $0x58] sm:$0xff]  ;;  %v33_v12 = vld [vmem:[%s263_s1 + $0x50] sm:$0xff] }
   0x5   :  { %v13_v13 = vld [vmem:[%s264_s0 + $0x10] sm:$0xff]  ;;  %v11_v14 = vld [vmem:[%s264_s0] sm:$0xff]  ;;  %v14_v19 = vld [vmem:[%s264_s0 + $0x18] sm:$0xff] }
   0x6   :  { %52 = vperm.xlu1 %126, %v26_v3   ;;  %42 = vperm.xlu0 %125, %v24_v4   ;;  %v12_v20 = vld [vmem:[%s264_s0 + $0x8] sm:$0xff] }
   0xa   :  { %62 = vperm.xlu1 %126, %v28_v5   ;;  %57 = vperm.xlu0 %125, %v27_v6  }
   0xe   :  { %72 = vperm.xlu1 %126, %v30_v7   ;;  %67 = vperm.xlu0 %125, %v29_v8  }
  0x12   :  { %82 = vperm.xlu1 %126, %v32_v9   ;;  %77 = vperm.xlu0 %125, %v31_v10  }
  0x16   :  { %92 = vperm.xlu1 %126, %v34_v11   ;;  %87 = vperm.xlu0 %125, %v33_v12  }
  0x81   :  { %v48_v15 = vpop.permute.xlu1 %47  ;;  %v38_v16 = vpop.permute.xlu0 %37 }
  0x82   :  { %v97_v17 = vadd.f32 %v48_v15, %v13_v13  ;;  %v95_v18 = vadd.f32 %v38_v16, %v11_v14 }
  0x84   :  { %110 = vst.msk [vmem:[%s265_s2 + $0x10] sm:$0xff] %vm107_vm0, %v97_v17  ;;  %108 = vst.msk [vmem:[%s265_s2] sm:$0xff] %vm107_vm0, %v95_v18 }
  0x85   :  { %v53_v21 = vpop.permute.xlu1 %52  ;;  %v43_v22 = vpop.permute.xlu0 %42 }
  0x86   :  { %v98_v23 = vadd.f32 %v53_v21, %v14_v19  ;;  %v96_v24 = vadd.f32 %v43_v22, %v12_v20 }
  0x89   :  { %v63_v27 = vpop.permute.xlu1 %62  ;;  %v58_v28 = vpop.permute.xlu0 %57 }
  0x8b   :  { %v16_v25 = vld [vmem:[%s264_s0 + $0x28] sm:$0xff]  ;;  %v15_v26 = vld [vmem:[%s264_s0 + $0x20] sm:$0xff] }
  0x8c   :  { %111 = vst.msk [vmem:[%s265_s2 + $0x18] sm:$0xff] %vm107_vm0, %v98_v23  ;;  %109 = vst.msk [vmem:[%s265_s2 + $0x8] sm:$0xff] %vm107_vm0, %v96_v24  ;;  %v100_v29 = vadd.f32 %v63_v27, %v16_v25  ;;  %v99_v30 = vadd.f32 %v58_v28, %v15_v26 }
  0x8d   :  { %v73_v33 = vpop.permute.xlu1 %72  ;;  %v68_v34 = vpop.permute.xlu0 %67 }
  0x91   :  { %v83_v39 = vpop.permute.xlu1 %82  ;;  %v78_v40 = vpop.permute.xlu0 %77 }
  0x93   :  { %v18_v31 = vld [vmem:[%s264_s0 + $0x38] sm:$0xff]  ;;  %v17_v32 = vld [vmem:[%s264_s0 + $0x30] sm:$0xff] }
  0x94   :  { %113 = vst.msk [vmem:[%s265_s2 + $0x28] sm:$0xff] %vm107_vm0, %v100_v29  ;;  %112 = vst.msk [vmem:[%s265_s2 + $0x20] sm:$0xff] %vm107_vm0, %v99_v30  ;;  %v102_v35 = vadd.f32 %v73_v33, %v18_v31  ;;  %v101_v36 = vadd.f32 %v68_v34, %v17_v32 }
  0x95   :  { %v93_v45 = vpop.permute.xlu1 %92  ;;  %v88_v46 = vpop.permute.xlu0 %87 }
  0x9b   :  { %v20_v37 = vld [vmem:[%s264_s0 + $0x48] sm:$0xff]  ;;  %v19_v38 = vld [vmem:[%s264_s0 + $0x40] sm:$0xff] }
  0x9c   :  { %115 = vst.msk [vmem:[%s265_s2 + $0x38] sm:$0xff] %vm107_vm0, %v102_v35  ;;  %114 = vst.msk [vmem:[%s265_s2 + $0x30] sm:$0xff] %vm107_vm0, %v101_v36  ;;  %v104_v41 = vadd.f32 %v83_v39, %v20_v37  ;;  %v103_v42 = vadd.f32 %v78_v40, %v19_v38 }
  0xa3   :  { %v22_v43 = vld [vmem:[%s264_s0 + $0x58] sm:$0xff]  ;;  %v21_v44 = vld [vmem:[%s264_s0 + $0x50] sm:$0xff] }
  0xa4   :  { %117 = vst.msk [vmem:[%s265_s2 + $0x48] sm:$0xff] %vm107_vm0, %v104_v41  ;;  %116 = vst.msk [vmem:[%s265_s2 + $0x40] sm:$0xff] %vm107_vm0, %v103_v42  ;;  %v106_v47 = vadd.f32 %v93_v45, %v22_v43  ;;  %v105_v48 = vadd.f32 %v88_v46, %v21_v44 }
  0xa6   :  { %119 = vst.msk [vmem:[%s265_s2 + $0x58] sm:$0xff] %vm107_vm0, %v106_v47  ;;  %118 = vst.msk [vmem:[%s265_s2 + $0x50] sm:$0xff] %vm107_vm0, %v105_v48 }

</bundles_post_ra>
